<compile_context>
chip_gen: v7x
topology: tpu7x:2x2x1
jax: 0.10.0
libtpu: 0.0.40
codegen_flags: <defaults>
</compile_context>

<pallas_src>
import jax
import jax.numpy as jnp
from jax.experimental import pallas as pl
from jax.experimental.pallas import tpu as pltpu

EPS = 1e-5


def _round_up(n, m):
    return ((n + m - 1) // m) * m


def _vmem_physical_bytes():
    """Physical per-core VMEM; falls back to 64 MiB (safe on every generation)."""
    try:
        info = pltpu.get_tpu_info()
        for name in ("vmem_capacity_bytes", "vmem_bytes", "vmem_size_bytes"):
            v = getattr(info, name, None)
            if v:
                return int(v)
    except Exception:
        pass
    return 64 << 20


def _choose_tm(B, tm_max=512):
    """Pick a batch tile that (a) is 8-aligned, (b) wastes <= ~12.5% padding,
    (c) prefers >= 2 grid steps (v7x 2-TC split of the 'parallel' axis), and
    (d) among ties prefers the largest tile (amortizes ~0.35us/grid-step)."""
    b8 = _round_up(B, 8)
    tm_max = max(8, _round_up(min(tm_max, b8), 8))
    candidates = {tm_max}
    for t in (1024, 512, 256, 128, 64, 32, 16, 8):
        if 8 <= t <= tm_max:
            candidates.add(t)
    if b8 % 16 == 0 and (b8 // 2) <= tm_max:
        candidates.add(b8 // 2)  # guarantees a 2-tile grid when it fits
    best_key, best_tm = None, None
    for tm in sorted(candidates):
        b_pad = _round_up(B, tm)
        waste_penalty = 1 if (b_pad - B) * 8 > b_pad else 0      # > 12.5% waste
        single_tile_penalty = 0 if b_pad // tm >= 2 else 1
        key = (waste_penalty, single_tile_penalty, -tm, b_pad - B)
        if best_key is None or key < best_key:
            best_key, best_tm = key, tm
    return best_tm


def _layernorm_f32(h, gamma, beta):
    # h: (TM, H) f32; gamma/beta: (1, H) f32. Biased variance + eps, like nn.LayerNorm.
    mean = jnp.mean(h, axis=-1, keepdims=True)
    mean_sq = jnp.mean(h * h, axis=-1, keepdims=True)
    var = jnp.maximum(mean_sq - mean * mean, 0.0)   # clamp: avoids rsqrt(neg) NaN
    inv = jax.lax.rsqrt(var + EPS)                  # EUP slot, effectively free under MXU
    return (h - mean) * inv * gamma + beta


def residual_block_kernel(x_ref, w1_ref, b1_ref, g1_ref, be1_ref,
                          w2_ref, b2_ref, g2_ref, be2_ref, o_ref):
    # Residual kept in f32 so the final add is exact.
    x = x_ref[...].astype(jnp.float32)

    # Hoist the (1, H) vector reads once per tile.
    b1, g1, be1 = b1_ref[...], g1_ref[...], be1_ref[...]
    b2, g2, be2 = b2_ref[...], g2_ref[...], be2_ref[...]

    # fc1 (bf16 MXU operands, f32 accumulate) + ReLU + LayerNorm1
    h = jnp.dot(x.astype(jnp.bfloat16), w1_ref[...],
                preferred_element_type=jnp.float32) + b1
    h = jnp.maximum(h, 0.0)
    h = _layernorm_f32(h, g1, be1)
    # Dropout: identity (eval mode).

    # fc2 (bf16 MXU operands, f32 accumulate) + ReLU + LayerNorm2
    h = jnp.dot(h.astype(jnp.bfloat16), w2_ref[...],
                preferred_element_type=jnp.float32) + b2
    h = jnp.maximum(h, 0.0)
    h = _layernorm_f32(h, g2, be2)
    # Dropout: identity (eval mode).

    o_ref[...] = (h + x).astype(o_ref.dtype)


def residual_block(x, params, *, tm_max=512):
    """x: (B, H) float32. params: fc weights in (in, out) layout (ideally bf16
    via prepare_params), biases and LayerNorm gamma/beta as (1, H) float32."""
    B, H = x.shape
    assert H % 128 == 0, "hidden_dim must be a multiple of 128"
    # TODO(synk): lane-padding path for non-128-multiple hidden dims.

    # Weights should be pre-cast to bf16 once (prepare_params); this fallback
    # cast costs an extra HBM round-trip per call, so avoid relying on it.
    w1, w2 = params["w1"], params["w2"]
    if w1.dtype != jnp.bfloat16:
        w1 = w1.astype(jnp.bfloat16)
    if w2.dtype != jnp.bfloat16:
        w2 = w2.astype(jnp.bfloat16)

    tm = _choose_tm(B, tm_max)
    b_pad = _round_up(B, tm)
    x_in = jnp.pad(x, ((0, b_pad - B), (0, 0))) if b_pad != B else x
    grid = (b_pad // tm,)

    io_spec = pl.BlockSpec((tm, H), lambda i: (i, 0))    # streamed per batch tile
    wmat_spec = pl.BlockSpec((H, H), lambda i: (0, 0))   # constant index_map -> VMEM-resident
    vec_spec = pl.BlockSpec((1, H), lambda i: (0, 0))    # constant index_map -> VMEM-resident

    in_specs = [
        io_spec,                         # x
        wmat_spec,                       # w1 (in, out), bf16
        vec_spec, vec_spec, vec_spec,    # b1, gamma1, beta1
        wmat_spec,                       # w2 (in, out), bf16
        vec_spec, vec_spec, vec_spec,    # b2, gamma2, beta2
    ]

    # VMEM budget. Resident operands are counted as if double-buffered
    # (conservative: Mosaic may allocate 2 buffers even for constant index_maps).
    resident_bytes = 2 * (2 * H * H * 2) + 2 * (6 * H * 4)   # bf16 weights + f32 vectors
    io_bytes = 2 * 2 * tm * H * 4                            # double-buffered x and out streams
    work_bytes = 6 * tm * H * 4                              # in-kernel f32 intermediates headroom
    vmem_needed = resident_bytes + io_bytes + work_bytes

    phys = _vmem_physical_bytes()
    cap = max(32 << 20, phys - (16 << 20))   # leave headroom for Mosaic scratch/sems
    if resident_bytes + io_bytes > cap:
        # TODO(synk): fall back to streaming w1/w2 column tiles over a second grid axis.
        raise ValueError(
            f"hidden_dim={H} needs ~{(resident_bytes + io_bytes) >> 20} MiB resident VMEM "
            f"> budget {cap >> 20} MiB; weight-streaming fallback not implemented.")
    vmem_limit = min(max(int(1.25 * vmem_needed) + (2 << 20), 32 << 20), cap)

    cost = pl.CostEstimate(
        flops=4 * b_pad * H * H,                 # two (b_pad,H)x(H,H) matmuls
        transcendentals=2 * b_pad,               # one rsqrt per row per LayerNorm
        bytes_accessed=(b_pad * H * 4) * 2 + 2 * H * H * 2 + 6 * H * 4,
    )

    out = pl.pallas_call(
        residual_block_kernel,
        out_shape=jax.ShapeDtypeStruct((b_pad, H), x.dtype),
        grid=grid,
        in_specs=in_specs,
        out_specs=io_spec,
        compiler_params=pltpu.CompilerParams(
            dimension_semantics=("parallel",),
            vmem_limit_bytes=vmem_limit,
        ),
        cost_estimate=cost,
    )(x_in, w1, params["b1"], params["g1"], params["be1"],
      w2, params["b2"], params["g2"], params["be2"])

    return out[:B] if b_pad != B else out


def init_params(key, hidden_dim):
    """Deterministic init mimicking nn.Linear default (uniform +-1/sqrt(fan_in))
    and nn.LayerNorm default (gamma=1, beta=0). Weights stored f32 (PyTorch-like)."""
    k1, k2, k3, k4 = jax.random.split(key, 4)
    bound = 1.0 / jnp.sqrt(hidden_dim)
    # PyTorch Linear weight is (out, in); store transposed as (in, out).
    w1 = jax.random.uniform(k1, (hidden_dim, hidden_dim), jnp.float32, -bound, bound)
    b1 = jax.random.uniform(k2, (1, hidden_dim), jnp.float32, -bound, bound)
    w2 = jax.random.uniform(k3, (hidden_dim, hidden_dim), jnp.float32, -bound, bound)
    b2 = jax.random.uniform(k4, (1, hidden_dim), jnp.float32, -bound, bound)
    g1 = jnp.ones((1, hidden_dim), jnp.float32)
    be1 = jnp.zeros((1, hidden_dim), jnp.float32)
    g2 = jnp.ones((1, hidden_dim), jnp.float32)
    be2 = jnp.zeros((1, hidden_dim), jnp.float32)
    return {"w1": w1, "b1": b1, "g1": g1, "be1": be1,
            "w2": w2, "b2": b2, "g2": g2, "be2": be2}


def prepare_params(params):
    """One-time prep: cast matmul weights to bf16 (2x MXU throughput, half the
    weight DMA/VMEM). Idempotent; do this ONCE, not per forward call."""
    p = dict(params)
    p["w1"] = params["w1"].astype(jnp.bfloat16)
    p["w2"] = params["w2"].astype(jnp.bfloat16)
    return p


def residual_block_ref(x, p):
    """Pure-JAX f32 reference (eval-mode dropout = identity)."""
    def ln(h, g, b):
        m = jnp.mean(h, axis=-1, keepdims=True)
        v = jnp.mean((h - m) ** 2, axis=-1, keepdims=True)
        return (h - m) / jnp.sqrt(v + EPS) * g + b
    h = jnp.maximum(x @ p["w1"] + p["b1"], 0.0)
    h = ln(h, p["g1"], p["be1"])
    h = jnp.maximum(h @ p["w2"] + p["b2"], 0.0)
    h = ln(h, p["g2"], p["be2"])
    return h + x


if __name__ == "__main__":
    key = jax.random.PRNGKey(0)
    kx, kp = jax.random.split(key)

    batch, hidden_dim = 16, 128
    x = jax.random.normal(kx, (batch, hidden_dim), jnp.float32)
    params_f32 = init_params(kp, hidden_dim)
    params = prepare_params(params_f32)   # one-time bf16 weight cast (not per call)

    out = jax.block_until_ready(residual_block(x, params))

    ref = residual_block_ref(x, params_f32)
    assert out.shape == (batch, hidden_dim)
    # bf16 MXU operands with f32 accumulation -> compare at bf16-level tolerance (intentional).
    assert jnp.allclose(out, ref, atol=5e-2, rtol=5e-2), "mismatch vs JAX reference"

    print("KERNEL_OK")
</pallas_src>

<mosaic_0001>
module attributes {stable_mosaic.version = 11 : i64} {
  func.func @residual_block_kernel(%arg0: i32, %arg1: memref<8x128xf32, #tpu.memory_space<vmem>>, %arg2: memref<128x128xbf16, #tpu.memory_space<vmem>>, %arg3: memref<1x128xf32, #tpu.memory_space<vmem>>, %arg4: memref<1x128xf32, #tpu.memory_space<vmem>>, %arg5: memref<1x128xf32, #tpu.memory_space<vmem>>, %arg6: memref<128x128xbf16, #tpu.memory_space<vmem>>, %arg7: memref<1x128xf32, #tpu.memory_space<vmem>>, %arg8: memref<1x128xf32, #tpu.memory_space<vmem>>, %arg9: memref<1x128xf32, #tpu.memory_space<vmem>>, %arg10: memref<8x128xf32, #tpu.memory_space<vmem>>) attributes {dimension_semantics = [#tpu.dimension_semantics<parallel>], iteration_bounds = array<i64: 2>, scalar_prefetch = 0 : i64, scratch_operands = 0 : i64, tpu.core_type = #tpu.core_type<tc>, window_params = [{transform_indices = @transform_0, window_bounds = array<i64: 8, 128>}, {pipeline_mode = #tpu.pipeline_mode<synchronous>, transform_indices = @transform_1, window_bounds = array<i64: 128, 128>}, {pipeline_mode = #tpu.pipeline_mode<synchronous>, transform_indices = @transform_2, window_bounds = array<i64: 1, 128>}, {pipeline_mode = #tpu.pipeline_mode<synchronous>, transform_indices = @transform_3, window_bounds = array<i64: 1, 128>}, {pipeline_mode = #tpu.pipeline_mode<synchronous>, transform_indices = @transform_4, window_bounds = array<i64: 1, 128>}, {pipeline_mode = #tpu.pipeline_mode<synchronous>, transform_indices = @transform_5, window_bounds = array<i64: 128, 128>}, {pipeline_mode = #tpu.pipeline_mode<synchronous>, transform_indices = @transform_6, window_bounds = array<i64: 1, 128>}, {pipeline_mode = #tpu.pipeline_mode<synchronous>, transform_indices = @transform_7, window_bounds = array<i64: 1, 128>}, {pipeline_mode = #tpu.pipeline_mode<synchronous>, transform_indices = @transform_8, window_bounds = array<i64: 1, 128>}, {transform_indices = @transform_9, window_bounds = array<i64: 8, 128>}]} {
    %c0 = arith.constant 0 : index
    %c0_0 = arith.constant 0 : index
    %0 = vector.load %arg1[%c0, %c0_0] : memref<8x128xf32, #tpu.memory_space<vmem>>, vector<8x128xf32>
    %c0_1 = arith.constant 0 : index
    %c0_2 = arith.constant 0 : index
    %1 = vector.load %arg3[%c0_1, %c0_2] : memref<1x128xf32, #tpu.memory_space<vmem>>, vector<1x128xf32>
    %c0_3 = arith.constant 0 : index
    %c0_4 = arith.constant 0 : index
    %2 = vector.load %arg4[%c0_3, %c0_4] : memref<1x128xf32, #tpu.memory_space<vmem>>, vector<1x128xf32>
    %c0_5 = arith.constant 0 : index
    %c0_6 = arith.constant 0 : index
    %3 = vector.load %arg5[%c0_5, %c0_6] : memref<1x128xf32, #tpu.memory_space<vmem>>, vector<1x128xf32>
    %c0_7 = arith.constant 0 : index
    %c0_8 = arith.constant 0 : index
    %4 = vector.load %arg7[%c0_7, %c0_8] : memref<1x128xf32, #tpu.memory_space<vmem>>, vector<1x128xf32>
    %c0_9 = arith.constant 0 : index
    %c0_10 = arith.constant 0 : index
    %5 = vector.load %arg8[%c0_9, %c0_10] : memref<1x128xf32, #tpu.memory_space<vmem>>, vector<1x128xf32>
    %c0_11 = arith.constant 0 : index
    %c0_12 = arith.constant 0 : index
    %6 = vector.load %arg9[%c0_11, %c0_12] : memref<1x128xf32, #tpu.memory_space<vmem>>, vector<1x128xf32>
    %7 = arith.truncf %0 : vector<8x128xf32> to vector<8x128xbf16>
    %c0_13 = arith.constant 0 : index
    %c0_14 = arith.constant 0 : index
    %8 = vector.load %arg2[%c0_13, %c0_14] : memref<128x128xbf16, #tpu.memory_space<vmem>>, vector<128x128xbf16>
    %cst = arith.constant dense<0.000000e+00> : vector<8x128xf32>
    %9 = tpu.matmul %7, %8, %cst {dimension_numbers = #tpu.dot_dimension_numbers<[1], [0], [0], [1], [0, 0, 1, 1], [], []>} : vector<8x128xbf16>, vector<128x128xbf16>, vector<8x128xf32> -> vector<8x128xf32>
    %10 = vector.broadcast %1 : vector<1x128xf32> to vector<8x128xf32>
    %11 = arith.addf %9, %10 : vector<8x128xf32>
    %cst_15 = arith.constant 0.000000e+00 : f32
    %12 = vector.broadcast %cst_15 : f32 to vector<8x128xf32>
    %13 = arith.maximumf %11, %12 : vector<8x128xf32>
    %cst_16 = arith.constant dense<0.000000e+00> : vector<8xf32>
    %14 = vector.multi_reduction <add>, %13, %cst_16 [1] : vector<8x128xf32> to vector<8xf32>
    %15 = vector.shape_cast %14 : vector<8xf32> to vector<8x1xf32>
    %cst_17 = arith.constant 1.280000e+02 : f32
    %16 = vector.broadcast %cst_17 : f32 to vector<8x1xf32>
    %17 = arith.divf %15, %16 : vector<8x1xf32>
    %18 = arith.mulf %13, %13 : vector<8x128xf32>
    %cst_18 = arith.constant dense<0.000000e+00> : vector<8xf32>
    %19 = vector.multi_reduction <add>, %18, %cst_18 [1] : vector<8x128xf32> to vector<8xf32>
    %20 = vector.shape_cast %19 : vector<8xf32> to vector<8x1xf32>
    %cst_19 = arith.constant 1.280000e+02 : f32
    %21 = vector.broadcast %cst_19 : f32 to vector<8x1xf32>
    %22 = arith.divf %20, %21 : vector<8x1xf32>
    %23 = arith.mulf %17, %17 : vector<8x1xf32>
    %24 = arith.subf %22, %23 : vector<8x1xf32>
    %cst_20 = arith.constant 0.000000e+00 : f32
    %25 = vector.broadcast %cst_20 : f32 to vector<8x1xf32>
    %26 = arith.maximumf %24, %25 : vector<8x1xf32>
    %cst_21 = arith.constant 9.99999974E-6 : f32
    %27 = vector.broadcast %cst_21 : f32 to vector<8x1xf32>
    %28 = arith.addf %26, %27 : vector<8x1xf32>
    %29 = math.rsqrt %28 : vector<8x1xf32>
    %30 = vector.broadcast %17 : vector<8x1xf32> to vector<8x128xf32>
    %31 = arith.subf %13, %30 : vector<8x128xf32>
    %32 = vector.broadcast %29 : vector<8x1xf32> to vector<8x128xf32>
    %33 = arith.mulf %31, %32 : vector<8x128xf32>
    %34 = vector.broadcast %2 : vector<1x128xf32> to vector<8x128xf32>
    %35 = arith.mulf %33, %34 : vector<8x128xf32>
    %36 = vector.broadcast %3 : vector<1x128xf32> to vector<8x128xf32>
    %37 = arith.addf %35, %36 : vector<8x128xf32>
    %38 = arith.truncf %37 : vector<8x128xf32> to vector<8x128xbf16>
    %c0_22 = arith.constant 0 : index
    %c0_23 = arith.constant 0 : index
    %39 = vector.load %arg6[%c0_22, %c0_23] : memref<128x128xbf16, #tpu.memory_space<vmem>>, vector<128x128xbf16>
    %cst_24 = arith.constant dense<0.000000e+00> : vector<8x128xf32>
    %40 = tpu.matmul %38, %39, %cst_24 {dimension_numbers = #tpu.dot_dimension_numbers<[1], [0], [0], [1], [0, 0, 1, 1], [], []>} : vector<8x128xbf16>, vector<128x128xbf16>, vector<8x128xf32> -> vector<8x128xf32>
    %41 = vector.broadcast %4 : vector<1x128xf32> to vector<8x128xf32>
    %42 = arith.addf %40, %41 : vector<8x128xf32>
    %cst_25 = arith.constant 0.000000e+00 : f32
    %43 = vector.broadcast %cst_25 : f32 to vector<8x128xf32>
    %44 = arith.maximumf %42, %43 : vector<8x128xf32>
    %cst_26 = arith.constant dense<0.000000e+00> : vector<8xf32>
    %45 = vector.multi_reduction <add>, %44, %cst_26 [1] : vector<8x128xf32> to vector<8xf32>
    %46 = vector.shape_cast %45 : vector<8xf32> to vector<8x1xf32>
    %cst_27 = arith.constant 1.280000e+02 : f32
    %47 = vector.broadcast %cst_27 : f32 to vector<8x1xf32>
    %48 = arith.divf %46, %47 : vector<8x1xf32>
    %49 = arith.mulf %44, %44 : vector<8x128xf32>
    %cst_28 = arith.constant dense<0.000000e+00> : vector<8xf32>
    %50 = vector.multi_reduction <add>, %49, %cst_28 [1] : vector<8x128xf32> to vector<8xf32>
    %51 = vector.shape_cast %50 : vector<8xf32> to vector<8x1xf32>
    %cst_29 = arith.constant 1.280000e+02 : f32
    %52 = vector.broadcast %cst_29 : f32 to vector<8x1xf32>
    %53 = arith.divf %51, %52 : vector<8x1xf32>
    %54 = arith.mulf %48, %48 : vector<8x1xf32>
    %55 = arith.subf %53, %54 : vector<8x1xf32>
    %cst_30 = arith.constant 0.000000e+00 : f32
    %56 = vector.broadcast %cst_30 : f32 to vector<8x1xf32>
    %57 = arith.maximumf %55, %56 : vector<8x1xf32>
    %cst_31 = arith.constant 9.99999974E-6 : f32
    %58 = vector.broadcast %cst_31 : f32 to vector<8x1xf32>
    %59 = arith.addf %57, %58 : vector<8x1xf32>
    %60 = math.rsqrt %59 : vector<8x1xf32>
    %61 = vector.broadcast %48 : vector<8x1xf32> to vector<8x128xf32>
    %62 = arith.subf %44, %61 : vector<8x128xf32>
    %63 = vector.broadcast %60 : vector<8x1xf32> to vector<8x128xf32>
    %64 = arith.mulf %62, %63 : vector<8x128xf32>
    %65 = vector.broadcast %5 : vector<1x128xf32> to vector<8x128xf32>
    %66 = arith.mulf %64, %65 : vector<8x128xf32>
    %67 = vector.broadcast %6 : vector<1x128xf32> to vector<8x128xf32>
    %68 = arith.addf %66, %67 : vector<8x128xf32>
    %69 = arith.addf %68, %0 : vector<8x128xf32>
    %c0_32 = arith.constant 0 : index
    %c0_33 = arith.constant 0 : index
    %70 = vector.load %arg10[%c0_32, %c0_33] : memref<8x128xf32, #tpu.memory_space<vmem>>, vector<8x128xf32>
    tpu.vector_store %arg10[%c0_32, %c0_33], %69 {strides = array<i32>} : memref<8x128xf32, #tpu.memory_space<vmem>>, vector<8x128xf32>,
    return
  }
  func.func @transform_0(%arg0: i32) -> (i32, i32) {
    %c0_i32 = arith.constant 0 : i32
    %c0_i32_0 = arith.constant 0 : i32
    return %arg0, %c0_i32 : i32, i32
  }
  func.func @transform_1(%arg0: i32) -> (i32, i32) {
    %c0_i32 = arith.constant 0 : i32
    %c0_i32_0 = arith.constant 0 : i32
    %c0_i32_1 = arith.constant 0 : i32
    return %c0_i32, %c0_i32_0 : i32, i32
  }
  func.func @transform_2(%arg0: i32) -> (i32, i32) {
    %c0_i32 = arith.constant 0 : i32
    %c0_i32_0 = arith.constant 0 : i32
    %c0_i32_1 = arith.constant 0 : i32
    return %c0_i32, %c0_i32_0 : i32, i32
  }
  func.func @transform_3(%arg0: i32) -> (i32, i32) {
    %c0_i32 = arith.constant 0 : i32
    %c0_i32_0 = arith.constant 0 : i32
    %c0_i32_1 = arith.constant 0 : i32
    return %c0_i32, %c0_i32_0 : i32, i32
  }
  func.func @transform_4(%arg0: i32) -> (i32, i32) {
    %c0_i32 = arith.constant 0 : i32
    %c0_i32_0 = arith.constant 0 : i32
    %c0_i32_1 = arith.constant 0 : i32
    return %c0_i32, %c0_i32_0 : i32, i32
  }
  func.func @transform_5(%arg0: i32) -> (i32, i32) {
    %c0_i32 = arith.constant 0 : i32
    %c0_i32_0 = arith.constant 0 : i32
    %c0_i32_1 = arith.constant 0 : i32
    return %c0_i32, %c0_i32_0 : i32, i32
  }
  func.func @transform_6(%arg0: i32) -> (i32, i32) {
    %c0_i32 = arith.constant 0 : i32
    %c0_i32_0 = arith.constant 0 : i32
    %c0_i32_1 = arith.constant 0 : i32
    return %c0_i32, %c0_i32_0 : i32, i32
  }
  func.func @transform_7(%arg0: i32) -> (i32, i32) {
    %c0_i32 = arith.constant 0 : i32
    %c0_i32_0 = arith.constant 0 : i32
    %c0_i32_1 = arith.constant 0 : i32
    return %c0_i32, %c0_i32_0 : i32, i32
  }
  func.func @transform_8(%arg0: i32) -> (i32, i32) {
    %c0_i32 = arith.constant 0 : i32
    %c0_i32_0 = arith.constant 0 : i32
    %c0_i32_1 = arith.constant 0 : i32
    return %c0_i32, %c0_i32_0 : i32, i32
  }
  func.func @transform_9(%arg0: i32) -> (i32, i32) {
    %c0_i32 = arith.constant 0 : i32
    %c0_i32_0 = arith.constant 0 : i32
    return %arg0, %c0_i32 : i32, i32
  }
}

</mosaic_0001>

<bundles_post_ra>
// kernel: tpu_custom_call.1
= control target key start
LH: loop header
LB: loop body
LE: loop exit
PB: predicated region body
PF: predicated region fallthrough
CT: control target
= control target key end

     0   :  { %14 = vsyncpa [#allocation3], 0  ;;  %s1433_s0 = inlined_call_operand.hbm [shape: f32[16,128], index: 0, kind: input, shape index: {}]   ;;  %s1434_s1 = inlined_call_operand.hbm [shape: bf16[128,128], index: 1, kind: input, shape index: {}]   ;;  %s1435_s2 = inlined_call_operand.vmem [shape: f32[1,128], index: 2, kind: input, shape index: {}]   ;;  %s1436_s3 = inlined_call_operand.vmem [shape: f32[1,128], index: 3, kind: input, shape index: {}]   ;;  %s1437_s4 = inlined_call_operand.vmem [shape: f32[1,128], index: 4, kind: input, shape index: {}]   ;;  %s1438_s5 = inlined_call_operand.hbm [shape: bf16[128,128], index: 5, kind: input, shape index: {}]   ;;  %s1439_s6 = inlined_call_operand.vmem [shape: f32[1,128], index: 6, kind: input, shape index: {}]   ;;  %s1440_s7 = inlined_call_operand.vmem [shape: f32[1,128], index: 7, kind: input, shape index: {}]   ;;  %s1441_s8 = inlined_call_operand.vmem [shape: f32[1,128], index: 8, kind: input, shape index: {}]   ;;  %s1442_s9 = inlined_call_operand.hbm [shape: f32[16,128], index: 9, kind: output, shape index: {}]  }
   0x1   :  { %16 = vsyncpa [#allocation3 + $0x1], 0 }
   0x2   :  { %17 = vsyncpa [#allocation6], 0 }
   0x3   :  { %18 = vsyncpa [#allocation4], 0 }
   0x4   :  { %20 = vsyncpa [#allocation4 + $0x1], 0  ;;  %s1174_s30 = smov 0   ;;  %s1176_s10 = smov 0  }
   0x5   :  { %s1178_s11 = smov 0   ;;  %s1180_s12 = smov 0  }
   0x6 LB: > { %s1195_s13 = sadd.s32 4294967295, %s1114_s12   ;;  %s771_s14 = sadd.s32 4294967294, %s1114_s12   ;;  %s1114_s12 = sphi %s1180_s12, %s1465_s12   ;;  %s1110_s11 = sphi %s1178_s11, %s1464_s11   ;;  %s1106_s10 = sphi %s1176_s10, %s1463_s10   ;;  %s1102_s30 = sphi %s1174_s30, %s1462_s30  }
   0x7   : > { %p46_p0 = scmp.ne.s32.totalorder %s1106_s10, %s1102_s30  ;;  %p1443_p1 = scmp.eq.s32.totalorder %s1195_s13, 0 }
   0x8   : > { %p244_p3 = scmp.eq.s32.totalorder %s771_s14, 1  ;;  %p772_p5 = scmp.ge.s32.totalorder %s1114_s12, 1 }
   0x9   : > { %p1204_p4 = por %p1443_p1, %p46_p0  ;;  %p251_p7 = scmp.lt.s32.totalorder %s1114_s12, 3 }
   0xa   : > { %p1209_p6 = por %p244_p3, %p46_p0  ;;  %s1116_s18 = smov [#allocation5]  }
   0xb   : > { %s1447_s15 = scalar_select %p1204_p4, 1, 0 }
   0xc   : > { %s1448_s16 = scalar_select %p1209_p6, 1, 0 }
   0xd   : > { %p1214_p8 = pnand %p772_p5, %p251_p7  ;;  %s263_s19 = sshll.u32 %s1116_s18, 4  ;;  %s1218_s19 = int_to_ptr.vmem [resolvable:$true] %s263_s19 }
   0xe   : > { %1449 = sst [smem:[#allocation12_spill]] %s1448_s16  ;;  %s1117_s21 = smov [#allocation7]  }
   0xf   : > { %p879_p9 = pneg %p1214_p8  ;;  %s285_s22 = sshll.u32 %s1117_s21, 4  ;;  %s1229_s22 = int_to_ptr.vmem [resolvable:$true] %s285_s22 }
  0x10   : > { %s958_s25 = scalar_lea.hbm %s1434_s1, 1024 }
  0x11   : > { %p1225_p11 = pnand %p879_p9, %p1443_p1  ;;  %p959_p12 = scmp.ne.s32.totalorder %s1434_s1, %s958_s25 }
  0x12   : > { %p965_p5 = scmp.lt.u32.totalorder %s958_s25, %s1434_s1 }
  0x13   : > { %p960_p13 = pneg %p1225_p11 }
  0x15   : > { %p961_p0 = pnand %p960_p13, %p959_p12 }
  0x17   : > { %p962_p3 = pneg %p961_p0 }
  0x19   : > { %p967_p7 = pnand %p965_p5, %p962_p3 }
  0x1b   : > { %970 = shalt.err (!%p967_p7)
}
  0x1c   : > { %s971_s14 = scalar_lea.vmem %s1218_s19, 1024  ;;  %p979_p2 = scmp.lt.s32.totalorder %s1218_s19, %s1218_s19 }
  0x1d   : > { %p972_p9 = scmp.ne.s32.totalorder %s1218_s19, %s971_s14  ;;  %p980_p12 = scmp.lt.s32.totalorder %s971_s14, %s971_s14 }
  0x1f   : > { %p974_p10 = pnand %p972_p9, %p960_p13  ;;  %p981_p0 = por %p980_p12, %p979_p2 }
  0x21   : > { %p975_p1 = pneg %p974_p10 }
  0x23   : > { %p982_p6 = pnand %p981_p0, %p975_p1 }
  0x25   : > { %985 = shalt.err (!%p982_p6)
}
  0x26   : > { %s1118_s18 = smov 64   ;;  %s1119_s21 = smov 4  }
  0x27   : > { %882 = dma.hbm_to_vmem [thread:$0]  (!%p1225_p11), %s1434_s1, 1024, %s1218_s19, [#allocation6], %s1118_s18, %s1118_s18, %s1119_s21  }
  0x28   : > { %s986_s27 = scalar_lea.hbm %s1438_s5, 1024 }
  0x29   : > { %p987_p2 = scmp.ne.s32.totalorder %s1438_s5, %s986_s27  ;;  %p993_p10 = scmp.lt.u32.totalorder %s986_s27, %s1438_s5 }
  0x2b   : > { %p989_p1 = pnand %p987_p2, %p960_p13 }
  0x2d   : > { %p990_p6 = pneg %p989_p1 }
  0x2f   : > { %p995_p3 = pnand %p993_p10, %p990_p6 }
  0x31   : > { %998 = shalt.err (!%p995_p3)
}
  0x32   : > { %s999_s19 = scalar_lea.vmem %s1229_s22, 1024  ;;  %p1007_p12 = scmp.lt.s32.totalorder %s1229_s22, %s1229_s22 }
  0x33   : > { %p1000_p5 = scmp.ne.s32.totalorder %s1229_s22, %s999_s19  ;;  %p1008_p0 = scmp.lt.s32.totalorder %s999_s19, %s999_s19 }
  0x35   : > { %p1002_p7 = pnand %p1000_p5, %p960_p13  ;;  %p1009_p2 = por %p1008_p0, %p1007_p12 }
  0x37   : > { %p1003_p9 = pneg %p1002_p7 }
  0x39   : > { %p1010_p1 = pnand %p1009_p2, %p1003_p9 }
  0x3b   : > { %1013 = shalt.err (!%p1010_p1)
}
  0x3c   : > { %885 = dma.hbm_to_vmem [thread:$0]  (!%p1225_p11), %s1438_s5, 1024, %s1229_s22, [#allocation6], %s1118_s18, %s1118_s18, %s1119_s21  }
  0x3d   : > { %s1284_s24 = sadd.s32 1, %s1114_s12   ;;  %s33_s20 = sadd.s32 1, %s1110_s11 }
  0x3e   : > { %s30_s25 = ssub.s32 %s1114_s12, %s1284_s24  ;;  %p40_p13 = scmp.ne.s32.totalorder %s1110_s11, %s1106_s10 }
  0x3f   : > { %p31_p6 = scmp.eq.s32.totalorder %s30_s25, 0  ;;  %p41_p10 = scmp.eq.s32.totalorder %s1114_s12, 0 }
  0x40   : > { %p1452_p3 = scmp.eq.s32.totalorder %s1195_s13, 1  ;;  %p896_p7 = scmp.lt.s32.totalorder %s1114_s12, 2 }
  0x41   : > { %s1300_s27 = scalar_select %p31_p6, %s1110_s11, %s33_s20  }
  0x42   : > { %p1294_p5 = por %p1452_p3, %p40_p13  ;;  %p42_p9 = por %p41_p10, %p40_p13 }
  0x43   : > { %s308_s28 = sand.u32 1, %s1110_s11   ;;  %s777_s22 = sshll.u32 %s1114_s12, 7 }
  0x44   : > { %s1453_s26 = scalar_select %p1294_p5, 1, 0 }
  0x45   : > { %s776_s29 = sshll.u32 %s308_s28, 3  ;;  %s1307_s14 = scalar_lea.hbm %s1433_s0, %s777_s22 }
  0x46   : > { %s312_s19 = scalar_lea.vmem [#allocation2], %s776_s29  ;;  %p1311_p11 = pnand %p896_p7, %p42_p9 }
  0x47   : > { %s319_s16 = sshll.u32 %s312_s19, 4  ;;  %s309_s20 = scalar_lea.sflag [#allocation3], %s308_s28  ;;  %s1309_s16 = int_to_ptr.vmem [resolvable:$true] %s319_s16 }
  0x48   : > { %s1014_s25 = scalar_lea.hbm %s1307_s14, 128  ;;  %p1016_p0 = pneg %p1311_p11 }
  0x49   : > { %p1015_p12 = scmp.ne.s32.totalorder %s1307_s14, %s1014_s25  ;;  %s1019_s18 = scalar_lea.hbm %s1433_s0, 256 }
  0x4a   : > { %p1020_p13 = scmp.lt.u32.totalorder %s1307_s14, %s1433_s0  ;;  %p1021_p6 = scmp.lt.u32.totalorder %s1019_s18, %s1014_s25 }
  0x4b   : > { %p1017_p2 = pnand %p1016_p0, %p1015_p12  ;;  %p1023_p3 = scmp.lt.u32.totalorder %s1014_s25, %s1307_s14 }
  0x4c   : > { %p1022_p10 = por %p1021_p6, %p1020_p13 }
  0x4d   : > { %p1018_p1 = pneg %p1017_p2 }
  0x4e   : > { %p1024_p7 = por %p1023_p3, %p1022_p10 }
  0x50   : > { %p1025_p9 = pnand %p1024_p7, %p1018_p1 }
  0x52   : > { %1028 = shalt.err (!%p1025_p9)
}
  0x53   : > { %s1029_s28 = scalar_lea.vmem %s1309_s16, 128  ;;  %s1120_s22 = smov [#allocation2]  }
  0x54   : > { %p1030_p12 = scmp.ne.s32.totalorder %s1309_s16, %s1029_s28  ;;  %s1034_s29 = sshll.u32 %s1120_s22, 4  ;;  %s1035_s29 = int_to_ptr.vmem [resolvable:$false] %s1034_s29 }
  0x55   : > { %s1036_s21 = scalar_lea.vmem %s1035_s29, 256  ;;  %p1037_p4 = scmp.lt.s32.totalorder %s1309_s16, %s1035_s29 }
  0x56   : > { %p1032_p2 = pnand %p1030_p12, %p1016_p0  ;;  %p1038_p13 = scmp.lt.s32.totalorder %s1036_s21, %s1029_s28 }
  0x58   : > { %p1033_p5 = pneg %p1032_p2  ;;  %p1039_p6 = por %p1038_p13, %p1037_p4 }
  0x5a   : > { %p1040_p10 = pnand %p1039_p6, %p1033_p5 }
  0x5c   : > { %1043 = shalt.err (!%p1040_p10)
}
  0x5d   : > { %889 = dma.hbm_to_vmem [thread:$0]  (!%p1311_p11), %s1307_s14, 128, %s1309_s16, %s309_s20  }
  0x5e   : > { %328 = sbr.rel (%p1214_p8) target bundleno = 931 (0x3a3), region = 56  ;;  %s1343_s25 = sand.u32 (!%p1214_p8), 1, %s1106_s10  }
  0x5f   : > { %s779_s18 = sshll.u32 (!%p1214_p8), %s1343_s25, 3  ;;  %s331_s19 = scalar_lea.sflag (!%p1214_p8), [#allocation3], %s1343_s25 }
  0x60   : > { %s1349_s28 = scalar_lea.vmem (!%p1214_p8), [#allocation2], %s779_s18  ;;  %p1455_p4 = scmp.ne.s32.totalorder (!%p1214_p8), %s1447_s15, 0 }
  0x65   : > { %1089 = dma.done.wait (%p1455_p4), %s331_s19, 128  }
  0x66   : > { %1091 = vsyncadd (%p1455_p4), %s331_s19, 4294967168  ;;  %p1456_p5 = scmp.eq.s32.totalorder %s1195_s13, 0 }
  0x68   : > { %1093 = dma.done.wait (%p1456_p5), [#allocation6], 2048   ;;  %p1457_p8 = pmov %p1456_p5 }
  0x69   : > { %v1121_v0 = vmov 0.0   ;;  %vm1122_vm0 = vmmov 0   ;;  %v938_v1 = vld [vmem:[#allocation5] sm:$0xff]   ;;  %v939_v2 = vld [vmem:[#allocation5 + $0x8] sm:$0xff]   ;;  %v940_v3 = vld [vmem:[#allocation5 + $0x10] sm:$0xff]   ;;  %s806_s17 = sshll.u32 %s1195_s13, 7 }
  0x6a   : > { %1095 = vsyncadd (%p1457_p8), [#allocation6], 4294965248  ;;  %827 = vmatprep.subr.bf16.mxu0 %v1121_v0  ;;  %843 = vmatprep.mubr.msk.bf16.mxu0 %vm1122_vm0, %v1121_v0  ;;  %v941_v4 = vld [vmem:[#allocation5 + $0x18] sm:$0xff]   ;;  %v942_v5 = vld [vmem:[#allocation5 + $0x20] sm:$0xff]   ;;  %s376_s14 = scalar_lea.vmem [#allocation8], %s779_s18  ;;  %s1389_s22 = scalar_lea.hbm %s1442_s9, %s806_s17 }
  0x6b   : > { %847 = vmatprep.subr.bf16.mxu1 %v1121_v0  ;;  %863 = vmatprep.mubr.msk.bf16.mxu1 %vm1122_vm0, %v1121_v0  ;;  %v943_v6 = vld [vmem:[#allocation5 + $0x28] sm:$0xff]   ;;  %v944_v7 = vld [vmem:[#allocation5 + $0x30] sm:$0xff]   ;;  %v945_v8 = vld [vmem:[#allocation5 + $0x38] sm:$0xff]   ;;  %s682_s16 = sshll.u32 %s376_s14, 4  ;;  %s669_s29 = scalar_lea.sflag [#allocation4], %s1343_s25  ;;  %s1391_s16 = int_to_ptr.vmem [resolvable:$true] %s682_s16 }
  0x6c   : > { %828 = vmatpush3.bf16.msra.mxu0 %v938_v1  ;;  %v1360_v9 = vld [vmem:[%s1349_s28] sm:$0xff]  ;;  %v946_v19 = vld [vmem:[#allocation7] sm:$0xff]   ;;  %v947_v20 = vld [vmem:[#allocation7 + $0x8] sm:$0xff]   ;;  %s1044_s21 = scalar_lea.vmem %s1391_s16, 128  ;;  %p1458_p0 = scmp.ne.s32.totalorder %s1453_s26, 0 }
  0x6d   : > { %829 = vmatprep.subr.bf16.mxu0 %v1121_v0  ;;  %v385_v10 = vpack.c.bf16 %v1360_v9, %v1360_v9  ;;  %v783_v11 = vld [vmem:[%s1435_s2] ss:$0 sm:$0xff]  ;;  %848 = vmatpush3.bf16.msra.mxu1 %v946_v19  ;;  %v949_v22 = vld [vmem:[#allocation7 + $0x18] sm:$0xff]   ;;  %v950_v23 = vld [vmem:[#allocation7 + $0x20] sm:$0xff]   ;;  %p1045_p11 = scmp.ne.s32.totalorder %s1391_s16, %s1044_s21  ;;  %s1123_s13 = smov [#allocation8]  }
  0x6e   : > { %849 = vmatprep.subr.bf16.mxu1 %v1121_v0  ;;  %v948_v21 = vld [vmem:[#allocation7 + $0x10] sm:$0xff]   ;;  %v951_v24 = vld [vmem:[#allocation7 + $0x28] sm:$0xff]   ;;  %v953_v26 = vld [vmem:[#allocation7 + $0x38] sm:$0xff]   ;;  %s1048_s18 = sshll.u32 %s1123_s13, 4  ;;  %s1049_s18 = int_to_ptr.vmem [resolvable:$false] %s1048_s18 }
  0x6f   : > { %v952_v25 = vld [vmem:[#allocation7 + $0x30] sm:$0xff]   ;;  %p1046_p1 = pnand %p1045_p11, %p1458_p0  ;;  %s1050_s19 = scalar_lea.vmem %s1049_s18, 256 }
  0x70   : > { %830 = vmatpush3.bf16.msra.mxu0 %v939_v2  ;;  %v792_v37 = vld [vmem:[%s1436_s3] ss:$0 sm:$0xff]  ;;  %p1051_p7 = scmp.lt.s32.totalorder %s1391_s16, %s1049_s18  ;;  %p1052_p9 = scmp.lt.s32.totalorder %s1050_s19, %s1044_s21 }
  0x71   : > { %831 = vmatprep.subr.bf16.mxu0 %v1121_v0  ;;  %850 = vmatpush3.bf16.msra.mxu1 %v947_v20  ;;  %v793_v39 = vld [vmem:[%s1437_s4] ss:$0 sm:$0xff]  ;;  %p1047_p3 = pneg %p1046_p1 }
  0x72   : > { %851 = vmatprep.subr.bf16.mxu1 %v1121_v0  ;;  %v794_v43 = vld [vmem:[%s1439_s6] ss:$0 sm:$0xff]  ;;  %p1053_p12 = por %p1052_p9, %p1051_p7 }
  0x73   : > { %v803_v61 = vld [vmem:[%s1440_s7] ss:$0 sm:$0xff] }
  0x74   : > { %832 = vmatpush3.bf16.msra.mxu0 %v940_v3  ;;  %v804_v63 = vld [vmem:[%s1441_s8] ss:$0 sm:$0xff]  ;;  %p1054_p2 = pnand %p1053_p12, %p1047_p3 }
  0x75   : > { %833 = vmatprep.subr.bf16.mxu0 %v1121_v0  ;;  %852 = vmatpush3.bf16.msra.mxu1 %v948_v21 }
  0x76   : > { %853 = vmatprep.subr.bf16.mxu1 %v1121_v0 }
  0x78   : > { %834 = vmatpush3.bf16.msra.mxu0 %v941_v4 }
  0x79   : > { %835 = vmatprep.subr.bf16.mxu0 %v1121_v0  ;;  %854 = vmatpush3.bf16.msra.mxu1 %v949_v22 }
  0x7a   : > { %855 = vmatprep.subr.bf16.mxu1 %v1121_v0 }
  0x7c   : > { %836 = vmatpush3.bf16.msra.mxu0 %v942_v5 }
  0x7d   : > { %837 = vmatprep.subr.bf16.mxu0 %v1121_v0  ;;  %856 = vmatpush3.bf16.msra.mxu1 %v950_v23 }
  0x7e   : > { %857 = vmatprep.subr.bf16.mxu1 %v1121_v0 }
  0x80   : > { %838 = vmatpush3.bf16.msra.mxu0 %v943_v6 }
  0x81   : > { %839 = vmatprep.subr.bf16.mxu0 %v1121_v0  ;;  %858 = vmatpush3.bf16.msra.mxu1 %v951_v24 }
  0x82   : > { %859 = vmatprep.subr.bf16.mxu1 %v1121_v0 }
  0x84   : > { %840 = vmatpush3.bf16.msra.mxu0 %v944_v7 }
  0x85   : > { %841 = vmatprep.subr.bf16.mxu0 %v1121_v0  ;;  %860 = vmatpush3.bf16.msra.mxu1 %v952_v25 }
  0x86   : > { %861 = vmatprep.subr.bf16.mxu1 %v1121_v0 }
  0x88   : > { %842 = vmatpush3.bf16.msra.mxu0 %v945_v8 }
  0x89   : > { %862 = vmatpush3.bf16.msra.mxu1 %v953_v26 }
  0x8b   : > { %844 = vmatmul.mubr.bf16.vlgmr.msra.gmra.mrb[0].mxu0 %v385_v10 }
 0x15e   : > { %v490_v12 = vpop.f32.mrb[0].mxu0 }
 0x15f   : > { %v491_v13 = vadd.f32 %v783_v11, %v490_v12  ;;  %v845_v14 = vpop.f32.mrb[1].mxu0 }
 0x160   : > { %v493_v15 = vpop.f32.mrb[2].mxu0 }
 0x161   : > { %v496_v16 = vmax.f32 %v491_v13, 0.0  ;;  %v846_v17 = vpop.f32.mrb[3].mxu0 }
 0x163   : > { %497 = vadd.xlane.f32.xlu0 %v496_v16  ;;  %v501_v18 = vmul.f32 %v496_v16, %v496_v16 }
 0x167   : > { %502 = vadd.xlane.f32.xlu0 %v501_v18 }
 0x1f0   : > { %v498_v27 = vpop.xlane.xlu0 %497 }
 0x1f1   : > { %v500_v28 = vmul.f32 0.0078125, %v498_v27 }
 0x1f3   : > { %v505_v30 = vmul.f32 %v500_v28, %v500_v28  ;;  %v510_v35 = vsub.f32 %v496_v16, %v500_v28 }
 0x1f4   : > { %v503_v29 = vpop.xlane.xlu0 %502 }
 0x1f5   : > { %v504_v31 = vmul.f32 0.0078125, %v503_v29 }
 0x1f7   : > { %v506_v32 = vsub.f32 %v504_v31, %v505_v30 }
 0x1f9   : > { %v507_v33 = vmax.f32 %v506_v32, 0.0 }
 0x1fb   : > { %v508_v34 = vadd.f32 1e-05, %v507_v33 }
 0x1fd   : > { %954 = vrsqrt.f32 %v508_v34 }
 0x207   : > { %v955_v36 = vpop.eup %954 }
 0x208   : > { %v511_v38 = vmul.f32 %v955_v36, %v510_v35 }
 0x20a   : > { %v518_v40 = vmul.f32 %v792_v37, %v511_v38 }
 0x20c   : > { %v525_v41 = vadd.f32 %v793_v39, %v518_v40 }
 0x20e   : > { %v526_v42 = vpack.c.bf16 %v525_v41, %v525_v41 }
 0x210   : > { %864 = vmatmul.mubr.bf16.vlgmr.msra.gmra.mrb[0].mxu1 %v526_v42 }
 0x2e3   : > { %v631_v44 = vpop.f32.mrb[0].mxu1 }
 0x2e4   : > { %v632_v45 = vadd.f32 %v794_v43, %v631_v44  ;;  %v865_v46 = vpop.f32.mrb[1].mxu1 }
 0x2e5   : > { %v634_v47 = vpop.f32.mrb[2].mxu1 }
 0x2e6   : > { %v637_v48 = vmax.f32 %v632_v45, 0.0  ;;  %v866_v49 = vpop.f32.mrb[3].mxu1 }
 0x2e8   : > { %638 = vadd.xlane.f32.xlu1 %v637_v48  ;;  %v641_v50 = vmul.f32 %v637_v48, %v637_v48 }
 0x2ec   : > { %642 = vadd.xlane.f32.xlu1 %v641_v50 }
 0x375   : > { %v639_v51 = vpop.xlane.xlu1 %638 }
 0x376   : > { %v640_v52 = vmul.f32 0.0078125, %v639_v51 }
 0x378   : > { %v645_v54 = vmul.f32 %v640_v52, %v640_v52  ;;  %v650_v59 = vsub.f32 %v637_v48, %v640_v52 }
 0x379   : > { %v643_v53 = vpop.xlane.xlu1 %642 }
 0x37a   : > { %v644_v55 = vmul.f32 0.0078125, %v643_v53 }
 0x37c   : > { %v646_v56 = vsub.f32 %v644_v55, %v645_v54 }
 0x37e   : > { %v647_v57 = vmax.f32 %v646_v56, 0.0 }
 0x380   : > { %v648_v58 = vadd.f32 1e-05, %v647_v57 }
 0x382   : > { %956 = vrsqrt.f32 %v648_v58 }
 0x38c   : > { %v957_v60 = vpop.eup %956 }
 0x38d   : > { %v651_v62 = vmul.f32 %v957_v60, %v650_v59 }
 0x38f   : > { %v658_v0 = vmul.f32 %v803_v61, %v651_v62 }
 0x391   : > { %v665_v1 = vadd.f32 %v804_v63, %v658_v0 }
 0x393   : > { %v666_v2 = vadd.f32 %v665_v1, %v1360_v9 }
 0x395   : > { %667 = vst [vmem:[%s376_s14] sm:$0xff] %v666_v2 }
 0x396   : > { %1057 = shalt.err (!%p1054_p2)
}
 0x397   : > { %s1058_s25 = scalar_lea.hbm %s1389_s22, 128  ;;  %s1062_s17 = scalar_lea.hbm %s1442_s9, 256 }
 0x398   : > { %p1059_p13 = scmp.ne.s32.totalorder %s1389_s22, %s1058_s25  ;;  %p1063_p4 = scmp.lt.u32.totalorder %s1389_s22, %s1442_s9 }
 0x399   : > { %p1064_p5 = scmp.lt.u32.totalorder %s1062_s17, %s1058_s25  ;;  %p1066_p11 = scmp.lt.u32.totalorder %s1058_s25, %s1389_s22 }
 0x39a   : > { %p1060_p6 = pnand %p1059_p13, %p1458_p0 }
 0x39b   : > { %p1065_p8 = por %p1064_p5, %p1063_p4 }
 0x39c   : > { %p1061_p10 = pneg %p1060_p6 }
 0x39d   : > { %p1067_p1 = por %p1066_p11, %p1065_p8 }
 0x39f   : > { %p1068_p3 = pnand %p1067_p1, %p1061_p10 }
 0x3a1   : > { %1071 = shalt.err (!%p1068_p3)
}
 0x3a2   : > { %877 = dma.vmem_to_hbm [thread:$0]  (%p1458_p0), %s1391_s16, 128, %s1389_s22, %s669_s29  }
 0x3a3 PF: > { %s1459_s20 = sld [smem:[#allocation12_spill]]  ;;  %s694_s21 = sand.u32 1, %s1102_s30  }
 0x3a4   : > { %p1461_p9 = scmp.ge.s32.totalorder %s1114_s12, 2  ;;  %s695_s13 = scalar_lea.sflag [#allocation4], %s694_s21 }
 0x3a9   : > { %p1460_p7 = scmp.ne.s32.totalorder %s1459_s20, 0 }
 0x3ab   : > { %p891_p12 = pnand %p1461_p9, %p1460_p7 }
 0x3ad   : > { %1097 = dma.done.wait (!%p891_p12), %s695_s13, 128  }
 0x3ae   : > { %1099 = vsyncadd (!%p891_p12), %s695_s13, 4294967168  ;;  %p23_p2 = scmp.ge.s32.totalorder %s1284_s24, 4   ;;  %s1462_s30 = smov %s1106_s10 }
 0x3af   : > { %s1463_s10 = smov %s1110_s11  ;;  %s1464_s11 = smov %s1300_s27 }
 0x3b0   : > { %s1465_s12 = smov %s1284_s24  ;;  %25 = sbr.rel (!%p23_p2) target bundleno = 6 (0x6), region = 109 }
 0x3b7   :  { %700 = vsyncpa [#allocation3], 1 }
 0x3b8   :  { %702 = vsyncpa [#allocation3 + $0x1], 1 }
 0x3b9   :  { %703 = vsyncpa [#allocation6], 1 }
 0x3ba   :  { %704 = vsyncpa [#allocation4], 1 }
 0x3bb   :  { %706 = vsyncpa [#allocation4 + $0x1], 1 }

</bundles_post_ra>
